<compile_context>
chip_gen: v6e
topology: v6e:2x2x1
jax: 0.10.0
libtpu: 0.0.40
codegen_flags: <defaults>
</compile_context>

<pallas_src>
import jax
import jax.numpy as jnp
from jax import lax
from jax.experimental import pallas as pl
from jax.experimental.pallas import tpu as pltpu

_EPS = 1e-12              # F.normalize default eps
_EPS_SQ = _EPS * _EPS     # max(||x||, eps) == sqrt(max(||x||^2, eps^2))


def _make_fusion_kernel(M, H):
    """Kernel over one row tile: for each modality m (static unroll),
    out[:, m*H:(m+1)*H] = w_m * x_m / max(||x_m||_2, eps)."""

    def kernel(wn_ref, *refs):
        emb_refs = refs[:M]
        out_ref = refs[M]
        for m in range(M):                                   # static Python unroll
            x = emb_refs[m][...].astype(jnp.float32)         # (tn, H)
            ss = jnp.sum(x * x, axis=-1, keepdims=True)      # VPU mul + XLU row-sum
            scale = wn_ref[m] * lax.rsqrt(jnp.maximum(ss, _EPS_SQ))   # EUP rsqrt
            out_ref[:, m * H:(m + 1) * H] = (x * scale).astype(out_ref.dtype)

    return kernel


def _pick_tile(N, M, H, itemsize, tile_n):
    """Largest friendly row tile: multiple of the sublane pack, <=1024 rows,
    double-buffered working set <= ~12 MiB, grid >= 2 steps when possible."""
    if tile_n is not None:
        assert N % tile_n == 0, "row tile must divide N"
        return tile_n
    sub = 8 if itemsize >= 4 else (16 if itemsize == 2 else 32)
    # double-buffered inputs + double-buffered output ~= 4 * tn * M * H * itemsize
    bytes_per_row = 4 * M * H * itemsize
    vmem_cap_rows = max(sub, (12 << 20) // max(1, bytes_per_row))
    cap = max(sub, min(N, 1024, vmem_cap_rows))
    tn = None
    for t in range(cap - cap % sub, 0, -sub):
        if N % t == 0:
            tn = t
            break
    if tn is None:
        tn = N                       # no sublane-friendly divisor: one full block
    # Prefer >= 2 row tiles so a v7x megacore can shard the grid across both TCs.
    if N // tn < 2:
        half = N // 2
        if half >= sub and half % sub == 0 and N % half == 0:
            tn = half
    return tn


def multi_view_fusion(embs, weight, *, tile_n=None):
    """JAX/Pallas equivalent of MultiViewFusion.forward.

    embs:   list of M arrays, each (N, H) (all modalities present, shared H).
    weight: (M, 1) parameter (the nn.Parameter of the module).
    Returns joint_emb: (N, M * H), matching torch.cat(..., dim=1).
    """
    # TODO(synk): PyTorch skips modalities whose emb is None (dynamic output
    # width) and allows per-modality hidden sizes; static shapes here require
    # all M modalities present sharing one hidden dim H.
    M = len(embs)
    assert M >= 1
    dtype = jnp.result_type(*[jnp.asarray(e).dtype for e in embs])
    if not jnp.issubdtype(dtype, jnp.floating):
        dtype = jnp.float32
    embs = [jnp.asarray(e, dtype) for e in embs]
    N, H = embs[0].shape
    for e in embs:
        assert e.shape == (N, H), "all modalities must share (N, H)"

    # Tiny (M,) softmax of the learned weights: done once in the wrapper,
    # passed to the kernel as SMEM scalars.
    wn = jax.nn.softmax(jnp.asarray(weight, jnp.float32).reshape(-1), axis=0)

    tn = _pick_tile(N, M, H, jnp.dtype(dtype).itemsize, tile_n)

    kernel = _make_fusion_kernel(M, H)
    emb_spec = pl.BlockSpec((tn, H), lambda i: (i, 0))

    out = pl.pallas_call(
        kernel,
        out_shape=jax.ShapeDtypeStruct((N, M * H), dtype),
        grid=(N // tn,),
        in_specs=[pl.BlockSpec(memory_space=pltpu.MemorySpace.SMEM)]   # softmaxed weights
                 + [emb_spec] * M,                                     # M separate inputs
        out_specs=pl.BlockSpec((tn, M * H), lambda i: (i, 0)),         # full-width lane-dense
        compiler_params=pltpu.CompilerParams(
            dimension_semantics=("parallel",)),
    )(wn, *embs)
    return out


def _reference(embs, weight):
    """Pure-JAX mirror of the PyTorch forward (dropout-free module)."""
    wn = jax.nn.softmax(jnp.asarray(weight, jnp.float32), axis=0)      # (M, 1)
    outs = []
    for i, e in enumerate(embs):
        e = jnp.asarray(e, jnp.float32)
        norm = jnp.sqrt(jnp.sum(e * e, axis=1, keepdims=True))
        outs.append(wn[i] * (e / jnp.maximum(norm, _EPS)))             # F.normalize
    return jnp.concatenate(outs, axis=1)


if __name__ == "__main__":
    # Small but lane-dense shapes: H multiple of 128, N multiple of 8.
    MODAL_NUM, N, H = 4, 16, 128

    key = jax.random.PRNGKey(0)
    keys = jax.random.split(key, MODAL_NUM + 1)
    embs = [jax.random.normal(keys[i], (N, H), jnp.float32) for i in range(MODAL_NUM)]
    # The module initializes weight = ones((M,1)); use arbitrary (trained-like)
    # values to exercise the softmax path as well.
    weight = jax.random.normal(keys[-1], (MODAL_NUM, 1), jnp.float32)

    joint = multi_view_fusion(embs, weight)
    jax.block_until_ready(joint)

    ref = _reference(embs, weight)
    assert joint.shape == (N, MODAL_NUM * H)
    assert jnp.allclose(joint, ref, rtol=1e-4, atol=1e-5), float(
        jnp.max(jnp.abs(joint - ref)))

    print("KERNEL_OK")
</pallas_src>

<mosaic_0001>
module attributes {stable_mosaic.version = 11 : i64} {
  func.func @kernel(%arg0: i32, %arg1: memref<4xf32, #tpu.memory_space<smem>>, %arg2: memref<8x128xf32, #tpu.memory_space<vmem>>, %arg3: memref<8x128xf32, #tpu.memory_space<vmem>>, %arg4: memref<8x128xf32, #tpu.memory_space<vmem>>, %arg5: memref<8x128xf32, #tpu.memory_space<vmem>>, %arg6: memref<8x512xf32, #tpu.memory_space<vmem>>) attributes {dimension_semantics = [#tpu.dimension_semantics<parallel>], iteration_bounds = array<i64: 2>, scalar_prefetch = 0 : i64, scratch_operands = 0 : i64, tpu.core_type = #tpu.core_type<tc>, window_params = [{transform_indices = @transform_0, window_bounds = array<i64: 4>}, {transform_indices = @transform_1, window_bounds = array<i64: 8, 128>}, {transform_indices = @transform_2, window_bounds = array<i64: 8, 128>}, {transform_indices = @transform_3, window_bounds = array<i64: 8, 128>}, {transform_indices = @transform_4, window_bounds = array<i64: 8, 128>}, {transform_indices = @transform_5, window_bounds = array<i64: 8, 512>}]} {
    %c0 = arith.constant 0 : index
    %c0_0 = arith.constant 0 : index
    %0 = vector.load %arg2[%c0, %c0_0] : memref<8x128xf32, #tpu.memory_space<vmem>>, vector<8x128xf32>
    %1 = arith.mulf %0, %0 : vector<8x128xf32>
    %cst = arith.constant dense<0.000000e+00> : vector<8xf32>
    %2 = vector.multi_reduction <add>, %1, %cst [1] : vector<8x128xf32> to vector<8xf32>
    %3 = vector.shape_cast %2 : vector<8xf32> to vector<8x1xf32>
    %c0_1 = arith.constant 0 : index
    %4 = memref.load %arg1[%c0_1] : memref<4xf32, #tpu.memory_space<smem>>
    %cst_2 = arith.constant 1.000000e-24 : f32
    %5 = vector.broadcast %cst_2 : f32 to vector<8x1xf32>
    %6 = arith.maximumf %3, %5 : vector<8x1xf32>
    %7 = math.rsqrt %6 : vector<8x1xf32>
    %8 = vector.broadcast %4 : f32 to vector<8x1xf32>
    %9 = arith.mulf %8, %7 : vector<8x1xf32>
    %10 = vector.broadcast %9 : vector<8x1xf32> to vector<8x128xf32>
    %11 = arith.mulf %0, %10 : vector<8x128xf32>
    %c0_3 = arith.constant 0 : index
    %c0_4 = arith.constant 0 : index
    %12 = vector.load %arg6[%c0_3, %c0_4] : memref<8x512xf32, #tpu.memory_space<vmem>>, vector<8x128xf32>
    tpu.vector_store %arg6[%c0_3, %c0_4], %11 {strides = array<i32>} : memref<8x512xf32, #tpu.memory_space<vmem>>, vector<8x128xf32>,
    %c0_5 = arith.constant 0 : index
    %c0_6 = arith.constant 0 : index
    %13 = vector.load %arg3[%c0_5, %c0_6] : memref<8x128xf32, #tpu.memory_space<vmem>>, vector<8x128xf32>
    %14 = arith.mulf %13, %13 : vector<8x128xf32>
    %cst_7 = arith.constant dense<0.000000e+00> : vector<8xf32>
    %15 = vector.multi_reduction <add>, %14, %cst_7 [1] : vector<8x128xf32> to vector<8xf32>
    %16 = vector.shape_cast %15 : vector<8xf32> to vector<8x1xf32>
    %c1 = arith.constant 1 : index
    %17 = memref.load %arg1[%c1] : memref<4xf32, #tpu.memory_space<smem>>
    %cst_8 = arith.constant 1.000000e-24 : f32
    %18 = vector.broadcast %cst_8 : f32 to vector<8x1xf32>
    %19 = arith.maximumf %16, %18 : vector<8x1xf32>
    %20 = math.rsqrt %19 : vector<8x1xf32>
    %21 = vector.broadcast %17 : f32 to vector<8x1xf32>
    %22 = arith.mulf %21, %20 : vector<8x1xf32>
    %23 = vector.broadcast %22 : vector<8x1xf32> to vector<8x128xf32>
    %24 = arith.mulf %13, %23 : vector<8x128xf32>
    %c0_9 = arith.constant 0 : index
    %c128 = arith.constant 128 : index
    %25 = vector.load %arg6[%c0_9, %c128] : memref<8x512xf32, #tpu.memory_space<vmem>>, vector<8x128xf32>
    tpu.vector_store %arg6[%c0_9, %c128], %24 {strides = array<i32>} : memref<8x512xf32, #tpu.memory_space<vmem>>, vector<8x128xf32>,
    %c0_10 = arith.constant 0 : index
    %c0_11 = arith.constant 0 : index
    %26 = vector.load %arg4[%c0_10, %c0_11] : memref<8x128xf32, #tpu.memory_space<vmem>>, vector<8x128xf32>
    %27 = arith.mulf %26, %26 : vector<8x128xf32>
    %cst_12 = arith.constant dense<0.000000e+00> : vector<8xf32>
    %28 = vector.multi_reduction <add>, %27, %cst_12 [1] : vector<8x128xf32> to vector<8xf32>
    %29 = vector.shape_cast %28 : vector<8xf32> to vector<8x1xf32>
    %c2 = arith.constant 2 : index
    %30 = memref.load %arg1[%c2] : memref<4xf32, #tpu.memory_space<smem>>
    %cst_13 = arith.constant 1.000000e-24 : f32
    %31 = vector.broadcast %cst_13 : f32 to vector<8x1xf32>
    %32 = arith.maximumf %29, %31 : vector<8x1xf32>
    %33 = math.rsqrt %32 : vector<8x1xf32>
    %34 = vector.broadcast %30 : f32 to vector<8x1xf32>
    %35 = arith.mulf %34, %33 : vector<8x1xf32>
    %36 = vector.broadcast %35 : vector<8x1xf32> to vector<8x128xf32>
    %37 = arith.mulf %26, %36 : vector<8x128xf32>
    %c0_14 = arith.constant 0 : index
    %c256 = arith.constant 256 : index
    %38 = vector.load %arg6[%c0_14, %c256] : memref<8x512xf32, #tpu.memory_space<vmem>>, vector<8x128xf32>
    tpu.vector_store %arg6[%c0_14, %c256], %37 {strides = array<i32>} : memref<8x512xf32, #tpu.memory_space<vmem>>, vector<8x128xf32>,
    %c0_15 = arith.constant 0 : index
    %c0_16 = arith.constant 0 : index
    %39 = vector.load %arg5[%c0_15, %c0_16] : memref<8x128xf32, #tpu.memory_space<vmem>>, vector<8x128xf32>
    %40 = arith.mulf %39, %39 : vector<8x128xf32>
    %cst_17 = arith.constant dense<0.000000e+00> : vector<8xf32>
    %41 = vector.multi_reduction <add>, %40, %cst_17 [1] : vector<8x128xf32> to vector<8xf32>
    %42 = vector.shape_cast %41 : vector<8xf32> to vector<8x1xf32>
    %c3 = arith.constant 3 : index
    %43 = memref.load %arg1[%c3] : memref<4xf32, #tpu.memory_space<smem>>
    %cst_18 = arith.constant 1.000000e-24 : f32
    %44 = vector.broadcast %cst_18 : f32 to vector<8x1xf32>
    %45 = arith.maximumf %42, %44 : vector<8x1xf32>
    %46 = math.rsqrt %45 : vector<8x1xf32>
    %47 = vector.broadcast %43 : f32 to vector<8x1xf32>
    %48 = arith.mulf %47, %46 : vector<8x1xf32>
    %49 = vector.broadcast %48 : vector<8x1xf32> to vector<8x128xf32>
    %50 = arith.mulf %39, %49 : vector<8x128xf32>
    %c0_19 = arith.constant 0 : index
    %c384 = arith.constant 384 : index
    %51 = vector.load %arg6[%c0_19, %c384] : memref<8x512xf32, #tpu.memory_space<vmem>>, vector<8x128xf32>
    tpu.vector_store %arg6[%c0_19, %c384], %50 {strides = array<i32>} : memref<8x512xf32, #tpu.memory_space<vmem>>, vector<8x128xf32>,
    return
  }
  func.func @transform_0(%arg0: i32) -> i32 {
    %c0_i32 = arith.constant 0 : i32
    %c0_i32_0 = arith.constant 0 : i32
    return %c0_i32 : i32
  }
  func.func @transform_1(%arg0: i32) -> (i32, i32) {
    %c0_i32 = arith.constant 0 : i32
    %c0_i32_0 = arith.constant 0 : i32
    return %arg0, %c0_i32 : i32, i32
  }
  func.func @transform_2(%arg0: i32) -> (i32, i32) {
    %c0_i32 = arith.constant 0 : i32
    %c0_i32_0 = arith.constant 0 : i32
    return %arg0, %c0_i32 : i32, i32
  }
  func.func @transform_3(%arg0: i32) -> (i32, i32) {
    %c0_i32 = arith.constant 0 : i32
    %c0_i32_0 = arith.constant 0 : i32
    return %arg0, %c0_i32 : i32, i32
  }
  func.func @transform_4(%arg0: i32) -> (i32, i32) {
    %c0_i32 = arith.constant 0 : i32
    %c0_i32_0 = arith.constant 0 : i32
    return %arg0, %c0_i32 : i32, i32
  }
  func.func @transform_5(%arg0: i32) -> (i32, i32) {
    %c0_i32 = arith.constant 0 : i32
    %c0_i32_0 = arith.constant 0 : i32
    return %arg0, %c0_i32 : i32, i32
  }
}

</mosaic_0001>

<bundles_post_ra>
// kernel: tpu_custom_call.1
= control target key start
LH: loop header
LB: loop body
LE: loop exit
PB: predicated region body
PF: predicated region fallthrough
CT: control target
= control target key end

     0   :  { %s1175_s0 = inlined_call_operand.hbm [shape: f32[4], index: 0, kind: input, shape index: {}]   ;;  %s1176_s1 = inlined_call_operand.hbm [shape: f32[16,128], index: 1, kind: input, shape index: {}]   ;;  %s1177_s2 = inlined_call_operand.hbm [shape: f32[16,128], index: 2, kind: input, shape index: {}]   ;;  %s1178_s3 = inlined_call_operand.hbm [shape: f32[16,128], index: 3, kind: input, shape index: {}]   ;;  %s1179_s4 = inlined_call_operand.hbm [shape: f32[16,128], index: 4, kind: input, shape index: {}]   ;;  %s1180_s5 = inlined_call_operand.hbm [shape: f32[16,512], index: 5, kind: output, shape index: {}]  }
   0x1   :  { %1191 = sst [smem:[#allocation22_spill]] %s1177_s2 }
   0x2   :  { %10 = vsyncpa [#allocation5], 0 }
   0x3   :  { %11 = vsyncpa [#allocation3], 0 }
   0x4   :  { %13 = vsyncpa [#allocation3 + $0x1], 0 }
   0x5   :  { %14 = vsyncpa [#allocation8], 0 }
   0x6   :  { %16 = vsyncpa [#allocation8 + $0x1], 0 }
   0x7   :  { %17 = vsyncpa [#allocation11], 0 }
   0x8   :  { %19 = vsyncpa [#allocation11 + $0x1], 0 }
   0x9   :  { %20 = vsyncpa [#allocation4], 0 }
   0xa   :  { %22 = vsyncpa [#allocation4 + $0x1], 0  ;;  %s912_s18 = smov 0   ;;  %s914_s19 = smov 0  }
   0xb   :  { %s916_s20 = smov 0   ;;  %s918_s21 = smov 0  }
   0xc LB: > { %1192 = sst [smem:[#allocation18_spill]] %s870_s20  ;;  %s933_s22 = sadd.s32 1, %s874_s21   ;;  %s874_s21 = sphi %s918_s21, %s1215_s21   ;;  %s870_s20 = sphi %s916_s20, %s1217_s20   ;;  %s866_s19 = sphi %s914_s19, %s1219_s19   ;;  %s862_s18 = sphi %s912_s18, %s1218_s18  }
   0xd   : > { %1193 = sst [smem:[#allocation19_spill]] %s874_s21  ;;  %s56_s23 = sadd.s32 1, %s870_s20 }
   0xe   : > { %1194 = sst [smem:[#allocation20_spill]] %s933_s22  ;;  %s53_s24 = ssub.s32 %s874_s21, %s933_s22 }
   0xf   : > { %p1181_p0 = scmp.ne.s32.totalorder %s870_s20, %s866_s19  ;;  %p54_p1 = scmp.eq.s32.totalorder %s53_s24, 0 }
  0x10   : > { %p64_p2 = scmp.eq.s32.totalorder %s874_s21, 0  ;;  %p631_p4 = scmp.lt.s32.totalorder %s874_s21, 2 }
  0x11   : > { %s944_s25 = scalar_select %p54_p1, %s870_s20, %s56_s23  }
  0x12   : > { %p65_p5 = por %p64_p2, %p1181_p0  ;;  %s950_s26 = sand.u32 1, %s870_s20  }
  0x13   : > { %1195 = sst [smem:[#allocation21_spill]] %s944_s25  ;;  %s953_s27 = sshll.u32 %s950_s26, 3 }
  0x14   : > { %s956_s28 = sshll.u32 %s874_s21, 7  ;;  %p958_p6 = pnand %p631_p4, %p65_p5 }
  0x15   : > { %s224_s30 = sand.u32 1, %s874_s21   ;;  %s1197_s2 = sld [smem:[#allocation22_spill]] }
  0x16   : > { %s228_s9 = scalar_lea.vmem [#allocation7], %s953_s27  ;;  %s970_s11 = scalar_lea.sflag [#allocation8], %s224_s30 }
  0x17   : > { %s235_s10 = sshll.u32 %s228_s9, 4  ;;  %p976_p8 = pneg %p958_p6  ;;  %s236_s10 = int_to_ptr.vmem [resolvable:$true] %s235_s10 }
  0x1b   : > { %s967_s8 = scalar_lea.hbm %s1197_s2, %s956_s28  ;;  %s680_s16 = scalar_lea.hbm %s1197_s2, 256 }
  0x1c   : > { %s675_s12 = scalar_lea.hbm %s967_s8, 128  ;;  %p681_p11 = scmp.lt.s32.totalorder %s967_s8, %s1197_s2 }
  0x1d   : > { %p676_p7 = scmp.ne.s32.totalorder %s967_s8, %s675_s12  ;;  %p682_p12 = scmp.lt.s32.totalorder %s680_s16, %s675_s12 }
  0x1f   : > { %p678_p9 = pnand %p976_p8, %p676_p7  ;;  %p683_p13 = por %p682_p12, %p681_p11 }
  0x21   : > { %p679_p10 = pneg %p678_p9 }
  0x23   : > { %p684_p1 = pnand %p683_p13, %p679_p10 }
  0x25   : > { %687 = shalt.err (!%p684_p1)
}
  0x26   : > { %s688_s24 = scalar_lea.vmem %s236_s10, 128  ;;  %s876_s30 = smov [#allocation7]  }
  0x27   : > { %p689_p2 = scmp.ne.s32.totalorder %s236_s10, %s688_s24  ;;  %s693_s6 = sshll.u32 %s876_s30, 4  ;;  %s694_s6 = int_to_ptr.vmem [resolvable:$false] %s693_s6 }
  0x28   : > { %s695_s7 = scalar_lea.vmem %s694_s6, 256  ;;  %p696_p7 = scmp.lt.s32.totalorder %s236_s10, %s694_s6 }
  0x29   : > { %p691_p4 = pnand %p689_p2, %p976_p8  ;;  %p697_p9 = scmp.lt.s32.totalorder %s695_s7, %s688_s24 }
  0x2b   : > { %p692_p5 = pneg %p691_p4  ;;  %p698_p3 = por %p697_p9, %p696_p7 }
  0x2d   : > { %p699_p0 = pnand %p698_p3, %p692_p5 }
  0x2f   : > { %702 = shalt.err (!%p699_p0)
}
  0x30   : > { %619 = dma.hbm_to_vmem [thread:$0]  (!%p958_p6), %s967_s8, 128, %s236_s10, %s970_s11  }
  0x31   : > { %s996_s9 = sadd.s32 4294967295, %s874_s21   ;;  %s567_s12 = sadd.s32 4294967294, %s874_s21  }
  0x32   : > { %p69_p0 = scmp.ne.s32.totalorder %s866_s19, %s862_s18  ;;  %p1182_p3 = scmp.eq.s32.totalorder %s996_s9, 0 }
  0x33   : > { %p171_p10 = scmp.eq.s32.totalorder %s996_s9, 1  ;;  %p177_p11 = scmp.eq.s32.totalorder %s567_s12, 1 }
  0x34   : > { %p1005_p12 = por %p1182_p3, %p69_p0  ;;  %p568_p13 = scmp.ge.s32.totalorder %s874_s21, 1 }
  0x35   : > { %p1200_p1 = scmp.ne.s32.totalorder %s870_s20, %s866_s19  ;;  %p1017_p4 = por %p177_p11, %p69_p0 }
  0x36   : > { %s1199_s14 = scalar_select %p1005_p12, 1, 0 }
  0x37   : > { %p1013_p2 = por %p171_p10, %p1200_p1  ;;  %p184_p5 = scmp.lt.s32.totalorder %s874_s21, 3 }
  0x38   : > { %s1202_s10 = scalar_select %p1017_p4, 1, 0 }
  0x39   : > { %s1201_s8 = scalar_select %p1013_p2, 1, 0 }
  0x3a   : > { %p1022_p7 = pnand %p568_p13, %p184_p5  ;;  %s1030_s23 = scalar_lea.hbm %s1176_s1, %s956_s28 }
  0x3b   : > { %s210_s24 = scalar_lea.vmem [#allocation6], %s953_s27  ;;  %s207_s6 = scalar_lea.sflag [#allocation3], %s950_s26 }
  0x3c   : > { %s1203_s15 = scalar_select %p1022_p7, 1, 0 }
  0x3d   : > { %s217_s30 = sshll.u32 %s210_s24, 4  ;;  %s703_s7 = scalar_lea.hbm %s1030_s23, 128  ;;  %s218_s30 = int_to_ptr.vmem [resolvable:$true] %s217_s30 }
  0x3e   : > { %p704_p0 = scmp.ne.s32.totalorder %s1030_s23, %s703_s7  ;;  %s708_s16 = scalar_lea.hbm %s1176_s1, 256 }
  0x3f   : > { %p709_p13 = scmp.lt.s32.totalorder %s1030_s23, %s1176_s1  ;;  %p710_p1 = scmp.lt.s32.totalorder %s708_s16, %s703_s7 }
  0x40   : > { %p706_p10 = pnand %p704_p0, %p976_p8 }
  0x41   : > { %p711_p5 = por %p710_p1, %p709_p13 }
  0x42   : > { %p707_p11 = pneg %p706_p10 }
  0x44   : > { %p712_p3 = pnand %p711_p5, %p707_p11 }
  0x46   : > { %715 = shalt.err (!%p712_p3)
}
  0x47   : > { %s716_s24 = scalar_lea.vmem %s218_s30, 128  ;;  %s877_s20 = smov [#allocation6]  }
  0x48   : > { %p717_p9 = scmp.ne.s32.totalorder %s218_s30, %s716_s24  ;;  %s721_s22 = sshll.u32 %s877_s20, 4  ;;  %s722_s22 = int_to_ptr.vmem [resolvable:$false] %s721_s22 }
  0x49   : > { %s723_s21 = scalar_lea.vmem %s722_s22, 256  ;;  %p724_p0 = scmp.lt.s32.totalorder %s218_s30, %s722_s22 }
  0x4a   : > { %p719_p4 = pnand %p717_p9, %p976_p8  ;;  %p725_p10 = scmp.lt.s32.totalorder %s723_s21, %s716_s24 }
  0x4c   : > { %p720_p2 = pneg %p719_p4  ;;  %p726_p12 = por %p725_p10, %p724_p0 }
  0x4e   : > { %p727_p7 = pnand %p726_p12, %p720_p2 }
  0x50   : > { %730 = shalt.err (!%p727_p7)
}
  0x51   : > { %616 = dma.hbm_to_vmem [thread:$0]  (!%p958_p6), %s1030_s23, 128, %s218_s30, %s207_s6  }
  0x52   : > { %p1204_p3 = scmp.eq.s32.totalorder %s996_s9, 0  ;;  %p1205_p4 = scmp.ne.s32.totalorder %s1203_s15, 0 }
  0x53   : > { %s1061_s21 = scalar_lea.hbm %s1178_s3, %s956_s28  ;;  %s246_s22 = scalar_lea.vmem [#allocation9], %s953_s27 }
  0x54   : > { %p1206_p9 = pneg %p1205_p4  ;;  %s253_s25 = sshll.u32 %s246_s22, 4  ;;  %s254_s25 = int_to_ptr.vmem [resolvable:$true] %s253_s25 }
  0x55   : > { %s878_s7 = smov [#allocation2]   ;;  %s742_s23 = scalar_lea.hbm %s1061_s21, 128 }
  0x56   : > { %p610_p11 = pnand %p1206_p9, %p1204_p3  ;;  %p743_p12 = scmp.ne.s32.totalorder %s1061_s21, %s742_s23 }
  0x57   : > { %s747_s17 = scalar_lea.hbm %s1178_s3, 256  ;;  %p748_p13 = scmp.lt.s32.totalorder %s1061_s21, %s1178_s3 }
  0x58   : > { %612 = dma.hbm_to_smem (!%p610_p11), %s1175_s0, 16, %s878_s7, [#allocation5]  }
  0x59   : > { %p745_p2 = pnand %p743_p12, %p976_p8  ;;  %p749_p1 = scmp.lt.s32.totalorder %s747_s17, %s742_s23 }
  0x5b   : > { %p746_p7 = pneg %p745_p2  ;;  %p750_p5 = por %p749_p1, %p748_p13 }
  0x5d   : > { %p751_p0 = pnand %p750_p5, %p746_p7 }
  0x5f   : > { %754 = shalt.err (!%p751_p0)
}
  0x60   : > { %s755_s20 = scalar_lea.vmem %s254_s25, 128  ;;  %s879_s22 = smov [#allocation9]  }
  0x61   : > { %p756_p10 = scmp.ne.s32.totalorder %s254_s25, %s755_s20  ;;  %s760_s7 = sshll.u32 %s879_s22, 4  ;;  %s761_s7 = int_to_ptr.vmem [resolvable:$false] %s760_s7 }
  0x62   : > { %s762_s12 = scalar_lea.vmem %s761_s7, 256  ;;  %p763_p11 = scmp.lt.s32.totalorder %s254_s25, %s761_s7 }
  0x63   : > { %p758_p3 = pnand %p756_p10, %p976_p8  ;;  %p764_p12 = scmp.lt.s32.totalorder %s762_s12, %s755_s20 }
  0x65   : > { %p759_p9 = pneg %p758_p3  ;;  %p765_p2 = por %p764_p12, %p763_p11 }
  0x67   : > { %p766_p4 = pnand %p765_p2, %p759_p9 }
  0x69   : > { %769 = shalt.err (!%p766_p4)
}
  0x6a   : > { %622 = dma.hbm_to_vmem [thread:$0]  (!%p958_p6), %s1061_s21, 128, %s254_s25, %s970_s11  }
  0x6b   : > { %s1088_s30 = scalar_lea.hbm %s1179_s4, %s956_s28  ;;  %s264_s6 = scalar_lea.vmem [#allocation10], %s953_s27 }
  0x6c   : > { %s271_s17 = sshll.u32 %s264_s6, 4  ;;  %s261_s24 = scalar_lea.sflag [#allocation11], %s950_s26  ;;  %s272_s17 = int_to_ptr.vmem [resolvable:$true] %s271_s17 }
  0x6d   : > { %s770_s2 = scalar_lea.hbm %s1088_s30, 128  ;;  %s775_s11 = scalar_lea.hbm %s1179_s4, 256 }
  0x6e   : > { %p771_p4 = scmp.ne.s32.totalorder %s1088_s30, %s770_s2  ;;  %p776_p1 = scmp.lt.s32.totalorder %s1088_s30, %s1179_s4 }
  0x6f   : > { %p777_p5 = scmp.lt.s32.totalorder %s775_s11, %s770_s2 }
  0x70   : > { %p773_p7 = pnand %p771_p4, %p976_p8 }
  0x71   : > { %p778_p0 = por %p777_p5, %p776_p1 }
  0x72   : > { %p774_p13 = pneg %p773_p7 }
  0x74   : > { %p779_p10 = pnand %p778_p0, %p774_p13 }
  0x76   : > { %782 = shalt.err (!%p779_p10)
}
  0x77   : > { %s783_s27 = scalar_lea.vmem %s272_s17, 128  ;;  %s880_s26 = smov [#allocation10]  }
  0x78   : > { %p784_p3 = scmp.ne.s32.totalorder %s272_s17, %s783_s27  ;;  %s788_s28 = sshll.u32 %s880_s26, 4  ;;  %s789_s28 = int_to_ptr.vmem [resolvable:$false] %s788_s28 }
  0x79   : > { %s790_s7 = scalar_lea.vmem %s789_s28, 256  ;;  %p791_p12 = scmp.lt.s32.totalorder %s272_s17, %s789_s28 }
  0x7a   : > { %p786_p9 = pnand %p784_p3, %p976_p8  ;;  %p792_p2 = scmp.lt.s32.totalorder %s790_s7, %s783_s27 }
  0x7c   : > { %p787_p11 = pneg %p786_p9  ;;  %p793_p4 = por %p792_p2, %p791_p12 }
  0x7e   : > { %p794_p7 = pnand %p793_p4, %p787_p11 }
  0x80   : > { %797 = shalt.err (!%p794_p7)
}
  0x81   : > { %625 = dma.hbm_to_vmem [thread:$0]  (!%p958_p6), %s1088_s30, 128, %s272_s17, %s261_s24  }
  0x82   : > { %p1207_p13 = scmp.ne.s32.totalorder %s1203_s15, 0 }
  0x83   : > { %p1208_p1 = scmp.eq.s32.totalorder (!%p1207_p13), %s996_s9, 0 }
  0x84   : > { %280 = sbr.rel (%p1207_p13) target bundleno = 329 (0x149), region = 40 }
  0x89   : > { %841 = dma.done.wait (%p1208_p1), [#allocation5], 16   ;;  %p1209_p8 = pmov %p1208_p1 }
  0x8a   : > { %s1115_s13 = sand.u32 1, %s866_s19   ;;  %p1210_p5 = scmp.ne.s32.totalorder %s1199_s14, 0 }
  0x8b   : > { %843 = vsyncadd (%p1209_p8), [#allocation5], 4294967280  ;;  %s581_s12 = sshll.u32 %s1115_s13, 3  ;;  %s287_s16 = scalar_lea.sflag [#allocation3], %s1115_s13 }
  0x8c   : > { %s290_s29 = scalar_lea.vmem [#allocation6], %s581_s12 }
  0x8d   : > { %845 = dma.done.wait (%p1210_p5), %s287_s16, 128  }
  0x8e   : > { %847 = vsyncadd (%p1210_p5), %s287_s16, 4294967168  ;;  %s295_s15 = sand.u32 1, %s996_s9   ;;  %s299_s30 = scalar_lea.vmem [#allocation7], %s581_s12 }
  0x8f   : > { %s296_s23 = scalar_lea.sflag [#allocation8], %s295_s15 }
  0x90   : > { %849 = dma.done.wait (%p1210_p5), %s296_s23, 256  }
  0x91   : > { %851 = vsyncadd (%p1210_p5), %s296_s23, 4294967040  ;;  %s308_s6 = scalar_lea.vmem [#allocation9], %s581_s12  ;;  %s314_s17 = scalar_lea.sflag [#allocation11], %s1115_s13 }
  0x92   : > { %s317_s24 = scalar_lea.vmem [#allocation10], %s581_s12 }
  0x93   : > { %853 = dma.done.wait (%p1210_p5), %s314_s17, 128  }
  0x94   : > { %855 = vsyncadd (%p1210_p5), %s314_s17, 4294967168 }
  0x95   : > { %322 = sfence }
  0x96   : > { %v382_v0 = vld [vmem:[%s308_s6] sm:$0xff]  ;;  %v393_v2 = vld [vmem:[%s317_s24] sm:$0xff]  ;;  %s587_s14 = sld [smem:[#allocation2 + $0x2]]  ;;  %s585_s11 = sshll.u32 %s1115_s13, 5 }
  0x97   : > { %v360_v1 = vld [vmem:[%s290_s29] sm:$0xff]  ;;  %v383_v3 = vmul.f32 %v382_v0, %v382_v0  ;;  %v371_v5 = vld [vmem:[%s299_s30] sm:$0xff]  ;;  %v394_v6 = vmul.f32 %v393_v2, %v393_v2  ;;  %s364_s2 = sld [smem:[#allocation2]]  ;;  %s359_s21 = scalar_lea.vmem [#allocation12], %s585_s11 }
  0x98   : > { %v361_v4 = vmul.f32 %v360_v1, %v360_v1  ;;  %v372_v7 = vmul.f32 %v371_v5, %v371_v5  ;;  %s588_s20 = sld [smem:[#allocation2 + $0x3]]  ;;  %s594_s25 = sshll.u32 %s996_s9, 9 }
  0x99   : > { %384 = vadd.xlane.f32.xlu1 %v383_v3  ;;  %s586_s22 = sld [smem:[#allocation2 + $0x1]]  ;;  %s419_s27 = sshll.u32 %s359_s21, 4  ;;  %s420_s27 = int_to_ptr.vmem [resolvable:$true] %s419_s27 }
  0x9a   : > { %362 = vadd.xlane.f32.xlu0 %v361_v4  ;;  %s1138_s7 = scalar_lea.hbm %s1180_s5, %s594_s25  ;;  %s405_s12 = scalar_lea.sflag [#allocation4], %s1115_s13 }
  0x9b   : > { %s798_s16 = scalar_lea.vmem %s420_s27, 512  ;;  %p1211_p0 = scmp.ne.s32.totalorder %s1201_s8, 0 }
  0x9c   : > { %v389_v16 = vstv %s587_s14  ;;  %p799_p6 = scmp.ne.s32.totalorder %s420_s27, %s798_s16  ;;  %s881_s9 = smov [#allocation12]  }
  0x9d   : > { %395 = vadd.xlane.f32.xlu1 %v394_v6  ;;  %v367_v17 = vstv %s364_s2  ;;  %s802_s29 = sshll.u32 %s881_s9, 4  ;;  %s803_s29 = int_to_ptr.vmem [resolvable:$false] %s802_s29 }
  0x9e   : > { %373 = vadd.xlane.f32.xlu0 %v372_v7  ;;  %v400_v22 = vstv %s588_s20  ;;  %p800_p10 = pnand %p799_p6, %p1211_p0  ;;  %s804_s15 = scalar_lea.vmem %s803_s29, 1024 }
  0x9f   : > { %v378_v23 = vstv %s586_s22  ;;  %p805_p9 = scmp.lt.s32.totalorder %s420_s27, %s803_s29  ;;  %p806_p11 = scmp.lt.s32.totalorder %s804_s15, %s798_s16 }
  0xa0   : > { %p801_p3 = pneg %p800_p10 }
  0xa1   : > { %p807_p12 = por %p806_p11, %p805_p9 }
  0xa3   : > { %p808_p2 = pnand %p807_p12, %p801_p3 }
 0x122   : > { %v385_v8 = vpop.xlane.xlu1 %384 }
 0x123   : > { %v363_v9 = vpop.xlane.xlu0 %362  ;;  %v387_v10 = vmax.f32 %v385_v8, 1e-24 }
 0x124   : > { %v365_v11 = vmax.f32 %v363_v9, 1e-24 }
 0x125   : > { %667 = vrsqrt.f32 %v387_v10 }
 0x126   : > { %669 = vrsqrt.f32 %v365_v11  ;;  %v396_v12 = vpop.xlane.xlu1 %395 }
 0x127   : > { %v374_v13 = vpop.xlane.xlu0 %373  ;;  %v398_v14 = vmax.f32 %v396_v12, 1e-24 }
 0x128   : > { %v376_v15 = vmax.f32 %v374_v13, 1e-24 }
 0x129   : > { %671 = vrsqrt.f32 %v398_v14 }
 0x12a   : > { %673 = vrsqrt.f32 %v376_v15 }
 0x132   : > { %v668_v18 = vpop.eup %667 }
 0x133   : > { %v670_v19 = vpop.eup %669  ;;  %v390_v20 = vmul.f32 %v668_v18, %v389_v16 }
 0x134   : > { %v368_v21 = vmul.f32 %v670_v19, %v367_v17 }
 0x135   : > { %v391_v24 = vmul.f32 %v390_v20, %v382_v0 }
 0x136   : > { %v672_v25 = vpop.eup %671  ;;  %v369_v26 = vmul.f32 %v368_v21, %v360_v1 }
 0x137   : > { %v674_v27 = vpop.eup %673  ;;  %v401_v28 = vmul.f32 %v672_v25, %v400_v22  ;;  %392 = vst [vmem:[%s359_s21 + $0x10] sm:$0xff] %v391_v24 }
 0x138   : > { %v379_v29 = vmul.f32 %v674_v27, %v378_v23  ;;  %370 = vst [vmem:[%s359_s21] sm:$0xff] %v369_v26 }
 0x139   : > { %v402_v30 = vmul.f32 %v401_v28, %v393_v2 }
 0x13a   : > { %v380_v31 = vmul.f32 %v379_v29, %v371_v5 }
 0x13b   : > { %403 = vst [vmem:[%s359_s21 + $0x18] sm:$0xff] %v402_v30 }
 0x13c   : > { %381 = vst [vmem:[%s359_s21 + $0x8] sm:$0xff] %v380_v31 }
 0x13d   : > { %811 = shalt.err (!%p808_p2)
}
 0x13e   : > { %s812_s23 = scalar_lea.hbm %s1138_s7, 512  ;;  %s816_s6 = scalar_lea.hbm %s1180_s5, 1024 }
 0x13f   : > { %p813_p4 = scmp.ne.s32.totalorder %s1138_s7, %s812_s23  ;;  %p817_p1 = scmp.lt.s32.totalorder %s1138_s7, %s1180_s5 }
 0x140   : > { %p818_p8 = scmp.lt.s32.totalorder %s816_s6, %s812_s23 }
 0x141   : > { %p814_p7 = pnand %p813_p4, %p1211_p0 }
 0x142   : > { %p819_p5 = por %p818_p8, %p817_p1 }
 0x143   : > { %p815_p13 = pneg %p814_p7 }
 0x145   : > { %p820_p6 = pnand %p819_p5, %p815_p13 }
 0x147   : > { %823 = shalt.err (!%p820_p6)
}
 0x148   : > { %607 = dma.vmem_to_hbm [thread:$0]  (%p1211_p0), %s420_s27, 512, %s1138_s7, %s405_s12  }
 0x149 PF: > { %s1212_s14 = sld [smem:[#allocation19_spill]]  ;;  %s431_s2 = sand.u32 1, %s862_s18  }
 0x14a   : > { %p1213_p10 = scmp.ne.s32.totalorder %s1202_s10, 0  ;;  %s432_s20 = scalar_lea.sflag [#allocation4], %s431_s2 }
 0x14f   : > { %p1214_p3 = scmp.ge.s32.totalorder %s1212_s14, 2 }
 0x151   : > { %p627_p9 = pnand %p1214_p3, %p1213_p10 }
 0x153   : > { %p628_p11 = pneg %p627_p9 }
 0x155   : > { %857 = dma.done.wait (%p628_p11), %s432_s20, 512  }
 0x156   : > { %859 = vsyncadd (%p628_p11), %s432_s20, 4294966784  ;;  %s1215_s21 = sld [smem:[#allocation20_spill]]  ;;  %s1218_s18 = smov %s866_s19 }
 0x157   : > { %s1216_s22 = sld [smem:[#allocation18_spill]] }
 0x158   : > { %s1217_s20 = sld [smem:[#allocation21_spill]] }
 0x15c   : > { %p25_p12 = scmp.ge.s32.totalorder %s1215_s21, 4  }
 0x15d   : > { %s1219_s19 = smov %s1216_s22 }
 0x15e   :  { %27 = sbr.rel (!%p25_p12) target bundleno = 12 (0xc), region = 127 }
 0x163   :  { %437 = vsyncpa [#allocation3], 1 }
 0x164   :  { %439 = vsyncpa [#allocation3 + $0x1], 1 }
 0x165   :  { %440 = vsyncpa [#allocation8], 1 }
 0x166   :  { %442 = vsyncpa [#allocation8 + $0x1], 1 }
 0x167   :  { %443 = vsyncpa [#allocation11], 1 }
 0x168   :  { %445 = vsyncpa [#allocation11 + $0x1], 1 }
 0x169   :  { %446 = vsyncpa [#allocation4], 1 }
 0x16a   :  { %448 = vsyncpa [#allocation4 + $0x1], 1 }
 0x16b   :  { %449 = vsyncpa [#allocation5], 1 }
 0x16c   :  { %451 = vsyncpa [#allocation5 + $0x1], 1 }

</bundles_post_ra>
